<compile_context>
chip_gen: v7x
topology: tpu7x:2x2x1
jax: 0.10.0
libtpu: 0.0.40
codegen_flags: <defaults>
</compile_context>

<pallas_src>
import functools

import jax
import jax.numpy as jnp
from jax.experimental import pallas as pl
from jax.experimental.pallas import tpu as pltpu


# ----------------------------- Pallas kernel ------------------------------- #
def _conv3x3_prelu_kernel(alpha_ref, x_ref, w_ref, b_ref, o_ref, *, offs, halo):
    # alpha_ref: (1,) f32 in SMEM
    # x_ref:     (Cin, L_in) f32, resident (constant index map)
    # w_ref:     (9, Cout, Cin) f32, resident
    # b_ref:     (Cout, 1) f32, resident
    # o_ref:     (Cout, TILE_M) f32, lane-dense output tile
    cout, tile_m = o_ref.shape

    # Lane-aligned dynamic window load: [base, base + tile_m + halo)
    base = pl.multiple_of(pl.program_id(0) * tile_m, 128)
    xwin = x_ref[:, pl.ds(base, tile_m + halo)]          # (Cin, tile_m + halo)

    acc = jnp.zeros((cout, tile_m), jnp.float32)
    # 9 taps, statically unrolled; each tap is a static (cheap XLU) lane shift
    # of the already-loaded window followed by an MXU dot.
    for t, off in enumerate(offs):
        xs = xwin[:, off:off + tile_m]                   # (Cin, tile_m)
        acc = acc + jnp.dot(w_ref[t], xs, preferred_element_type=jnp.float32)

    acc = acc + b_ref[...]                               # (Cout, 1) broadcast
    alpha = alpha_ref[0]
    o_ref[...] = jnp.where(acc >= 0.0, acc, alpha * acc).astype(o_ref.dtype)


# ------------------------------ Wrapper ------------------------------------ #
def _round_up(v, m):
    return ((v + m - 1) // m) * m


@functools.partial(jax.jit, static_argnames=("up_scale", "tile_m"))
def upsample_block(x, conv_w, conv_b, prelu_alpha, *, up_scale, tile_m=None):
    """Forward of UpsampleBLock.

    x:           (N, Cin, H, W)        float32, NCHW
    conv_w:      (Cin*r^2, Cin, 3, 3)  float32  (PyTorch OIHW)
    conv_b:      (Cin*r^2,)            float32
    prelu_alpha: scalar                float32  (single shared PReLU parameter)
    returns:     (N, Cin, H*r, W*r)
    """
    N, Cin, H, W = x.shape
    r = up_scale
    Cout = Cin * r * r
    Hp, Wp = H + 2, W + 2
    L = N * Hp * Wp                          # flattened padded-spatial positions

    # Tile size: multiple of 128, aim for ~8 grid steps, clamp to [256, 2048].
    if tile_m is None:
        t = _round_up(-(-L // 8), 128)
        tile_m = max(256, min(2048, t))

    halo = _round_up(2 * Wp + 2, 128)        # max tap offset, rounded to lanes
    num_tiles = -(-L // tile_m)
    m_pad = num_tiles * tile_m
    l_in = m_pad + halo

    # Input: NCHW -> zero-pad spatial -> (Cin, N*Hp*Wp) -> lane-pad to l_in.
    # (Single cheap pass over the small pre-upsample tensor; no 9x im2col.)
    xpad = jnp.pad(x, ((0, 0), (0, 0), (1, 1), (1, 1)))
    xflat = jnp.transpose(xpad, (1, 0, 2, 3)).reshape(Cin, L)
    xflat = jnp.pad(xflat, ((0, 0), (0, l_in - L))).astype(jnp.float32)

    # Weights: OIHW -> (9, Cout, Cin), tap index t = di*3 + dj.
    w9 = jnp.transpose(conv_w, (2, 3, 0, 1)).reshape(9, Cout, Cin).astype(jnp.float32)
    bias = conv_b.reshape(Cout, 1).astype(jnp.float32)
    alpha = jnp.asarray(prelu_alpha, jnp.float32).reshape(1)

    # Tap offsets in the flattened padded layout: (di, dj) -> di*Wp + dj.
    offs = tuple(di * Wp + dj for di in range(3) for dj in range(3))

    kernel = functools.partial(_conv3x3_prelu_kernel, offs=offs, halo=halo)

    out = pl.pallas_call(
        kernel,
        out_shape=jax.ShapeDtypeStruct((Cout, m_pad), jnp.float32),
        grid=(num_tiles,),
        in_specs=[
            pl.BlockSpec(memory_space=pltpu.MemorySpace.SMEM),   # alpha scalar
            pl.BlockSpec((Cin, l_in), lambda i: (0, 0)),         # x (resident)
            pl.BlockSpec((9, Cout, Cin), lambda i: (0, 0, 0)),   # weights
            pl.BlockSpec((Cout, 1), lambda i: (0, 0)),           # bias
        ],
        out_specs=pl.BlockSpec((Cout, tile_m), lambda i: (0, i)),
        compiler_params=pltpu.CompilerParams(
            dimension_semantics=("parallel",)),
    )(alpha, xflat, w9, bias)

    # Single post-pass: drop padded/garbage positions and pixel-shuffle
    # directly from (Cout, M): (c, i, j, n, h, w) -> (n, c, h, i, w, j).
    y = out[:, :L].reshape(Cin, r, r, N, Hp, Wp)[:, :, :, :, :H, :W]
    y = jnp.transpose(y, (3, 0, 4, 1, 5, 2)).reshape(N, Cin, H * r, W * r)
    return y


# ------------------------------- Reference --------------------------------- #
def _pixel_shuffle_ref(x, r):
    N, Crr, H, W = x.shape
    C = Crr // (r * r)
    x = x.reshape(N, C, r, r, H, W)
    x = jnp.transpose(x, (0, 1, 4, 2, 5, 3))
    return x.reshape(N, C, H * r, W * r)


def _reference(x, conv_w, conv_b, prelu_alpha, up_scale):
    y = jax.lax.conv_general_dilated(
        x, conv_w, window_strides=(1, 1), padding=((1, 1), (1, 1)),
        dimension_numbers=("NCHW", "OIHW", "NCHW"))
    y = y + conv_b.reshape(1, -1, 1, 1)
    y = _pixel_shuffle_ref(y, up_scale)
    return jnp.where(y >= 0, y, prelu_alpha * y)


if __name__ == "__main__":
    key = jax.random.PRNGKey(0)
    N, Cin, H, W = 2, 4, 16, 16
    up_scale = 2
    Cout = Cin * up_scale ** 2

    kx, kw, kb = jax.random.split(key, 3)
    x = jax.random.normal(kx, (N, Cin, H, W), jnp.float32)
    # Deterministic synthetic parameter init (matches PyTorch Conv2d bounds).
    fan_in = Cin * 9
    bound = 1.0 / (fan_in ** 0.5)
    conv_w = jax.random.uniform(kw, (Cout, Cin, 3, 3), jnp.float32, -bound, bound)
    conv_b = jax.random.uniform(kb, (Cout,), jnp.float32, -bound, bound)
    prelu_alpha = jnp.float32(0.25)   # PyTorch PReLU default init

    out = upsample_block(x, conv_w, conv_b, prelu_alpha, up_scale=up_scale)
    out = jax.block_until_ready(out)

    ref = _reference(x, conv_w, conv_b, prelu_alpha, up_scale)
    assert out.shape == (N, Cin, H * up_scale, W * up_scale)
    assert jnp.allclose(out, ref, atol=5e-4, rtol=5e-4)

    print("KERNEL_OK")
</pallas_src>

<mosaic_0001>
module attributes {stable_mosaic.version = 11 : i64} {
  func.func @_conv3x3_prelu_kernel(%arg0: i32, %arg1: memref<1xf32, #tpu.memory_space<smem>>, %arg2: memref<4x896xf32, #tpu.memory_space<vmem>>, %arg3: memref<9x16x4xf32, #tpu.memory_space<vmem>>, %arg4: memref<16x1xf32, #tpu.memory_space<vmem>>, %arg5: memref<16x256xf32, #tpu.memory_space<vmem>>) attributes {dimension_semantics = [#tpu.dimension_semantics<parallel>], iteration_bounds = array<i64: 3>, scalar_prefetch = 0 : i64, scratch_operands = 0 : i64, tpu.core_type = #tpu.core_type<tc>, window_params = [{transform_indices = @transform_0, window_bounds = array<i64: 1>}, {pipeline_mode = #tpu.pipeline_mode<synchronous>, transform_indices = @transform_1, window_bounds = array<i64: 4, 896>}, {pipeline_mode = #tpu.pipeline_mode<synchronous>, transform_indices = @transform_2, window_bounds = array<i64: 9, 16, 4>}, {pipeline_mode = #tpu.pipeline_mode<synchronous>, transform_indices = @transform_3, window_bounds = array<i64: 16, 1>}, {transform_indices = @transform_4, window_bounds = array<i64: 16, 256>}]} {
    %c256_i32 = arith.constant 256 : i32
    %0 = arith.muli %arg0, %c256_i32 : i32
    %1 = tpu.assume_multiple %0, 128 : i32
    %c0 = arith.constant 0 : index
    %2 = arith.index_cast %1 : i32 to index
    %3 = vector.load %arg2[%c0, %2] : memref<4x896xf32, #tpu.memory_space<vmem>>, vector<4x384xf32>
    %cst = arith.constant 0.000000e+00 : f32
    %4 = vector.broadcast %cst : f32 to vector<16x256xf32>
    %5 = vector.extract_strided_slice %3 {offsets = [0, 0], sizes = [4, 256], strides = [1, 1]} : vector<4x384xf32> to vector<4x256xf32>
    %c0_0 = arith.constant 0 : index
    %c0_1 = arith.constant 0 : index
    %c0_2 = arith.constant 0 : index
    %6 = vector.load %arg3[%c0_0, %c0_1, %c0_2] : memref<9x16x4xf32, #tpu.memory_space<vmem>>, vector<1x16x4xf32>
    %7 = vector.shape_cast %6 : vector<1x16x4xf32> to vector<16x4xf32>
    %cst_3 = arith.constant dense<0.000000e+00> : vector<16x256xf32>
    %8 = tpu.matmul %7, %5, %cst_3 {dimension_numbers = #tpu.dot_dimension_numbers<[1], [0], [0], [1], [0, 0, 1, 1], [], []>} : vector<16x4xf32>, vector<4x256xf32>, vector<16x256xf32> -> vector<16x256xf32>
    %9 = arith.addf %4, %8 : vector<16x256xf32>
    %10 = vector.extract_strided_slice %3 {offsets = [0, 1], sizes = [4, 256], strides = [1, 1]} : vector<4x384xf32> to vector<4x256xf32>
    %c1 = arith.constant 1 : index
    %c0_4 = arith.constant 0 : index
    %c0_5 = arith.constant 0 : index
    %11 = vector.load %arg3[%c1, %c0_4, %c0_5] : memref<9x16x4xf32, #tpu.memory_space<vmem>>, vector<1x16x4xf32>
    %12 = vector.shape_cast %11 : vector<1x16x4xf32> to vector<16x4xf32>
    %cst_6 = arith.constant dense<0.000000e+00> : vector<16x256xf32>
    %13 = tpu.matmul %12, %10, %cst_6 {dimension_numbers = #tpu.dot_dimension_numbers<[1], [0], [0], [1], [0, 0, 1, 1], [], []>} : vector<16x4xf32>, vector<4x256xf32>, vector<16x256xf32> -> vector<16x256xf32>
    %14 = arith.addf %9, %13 : vector<16x256xf32>
    %15 = vector.extract_strided_slice %3 {offsets = [0, 2], sizes = [4, 256], strides = [1, 1]} : vector<4x384xf32> to vector<4x256xf32>
    %c2 = arith.constant 2 : index
    %c0_7 = arith.constant 0 : index
    %c0_8 = arith.constant 0 : index
    %16 = vector.load %arg3[%c2, %c0_7, %c0_8] : memref<9x16x4xf32, #tpu.memory_space<vmem>>, vector<1x16x4xf32>
    %17 = vector.shape_cast %16 : vector<1x16x4xf32> to vector<16x4xf32>
    %cst_9 = arith.constant dense<0.000000e+00> : vector<16x256xf32>
    %18 = tpu.matmul %17, %15, %cst_9 {dimension_numbers = #tpu.dot_dimension_numbers<[1], [0], [0], [1], [0, 0, 1, 1], [], []>} : vector<16x4xf32>, vector<4x256xf32>, vector<16x256xf32> -> vector<16x256xf32>
    %19 = arith.addf %14, %18 : vector<16x256xf32>
    %20 = vector.extract_strided_slice %3 {offsets = [0, 18], sizes = [4, 256], strides = [1, 1]} : vector<4x384xf32> to vector<4x256xf32>
    %c3 = arith.constant 3 : index
    %c0_10 = arith.constant 0 : index
    %c0_11 = arith.constant 0 : index
    %21 = vector.load %arg3[%c3, %c0_10, %c0_11] : memref<9x16x4xf32, #tpu.memory_space<vmem>>, vector<1x16x4xf32>
    %22 = vector.shape_cast %21 : vector<1x16x4xf32> to vector<16x4xf32>
    %cst_12 = arith.constant dense<0.000000e+00> : vector<16x256xf32>
    %23 = tpu.matmul %22, %20, %cst_12 {dimension_numbers = #tpu.dot_dimension_numbers<[1], [0], [0], [1], [0, 0, 1, 1], [], []>} : vector<16x4xf32>, vector<4x256xf32>, vector<16x256xf32> -> vector<16x256xf32>
    %24 = arith.addf %19, %23 : vector<16x256xf32>
    %25 = vector.extract_strided_slice %3 {offsets = [0, 19], sizes = [4, 256], strides = [1, 1]} : vector<4x384xf32> to vector<4x256xf32>
    %c4 = arith.constant 4 : index
    %c0_13 = arith.constant 0 : index
    %c0_14 = arith.constant 0 : index
    %26 = vector.load %arg3[%c4, %c0_13, %c0_14] : memref<9x16x4xf32, #tpu.memory_space<vmem>>, vector<1x16x4xf32>
    %27 = vector.shape_cast %26 : vector<1x16x4xf32> to vector<16x4xf32>
    %cst_15 = arith.constant dense<0.000000e+00> : vector<16x256xf32>
    %28 = tpu.matmul %27, %25, %cst_15 {dimension_numbers = #tpu.dot_dimension_numbers<[1], [0], [0], [1], [0, 0, 1, 1], [], []>} : vector<16x4xf32>, vector<4x256xf32>, vector<16x256xf32> -> vector<16x256xf32>
    %29 = arith.addf %24, %28 : vector<16x256xf32>
    %30 = vector.extract_strided_slice %3 {offsets = [0, 20], sizes = [4, 256], strides = [1, 1]} : vector<4x384xf32> to vector<4x256xf32>
    %c5 = arith.constant 5 : index
    %c0_16 = arith.constant 0 : index
    %c0_17 = arith.constant 0 : index
    %31 = vector.load %arg3[%c5, %c0_16, %c0_17] : memref<9x16x4xf32, #tpu.memory_space<vmem>>, vector<1x16x4xf32>
    %32 = vector.shape_cast %31 : vector<1x16x4xf32> to vector<16x4xf32>
    %cst_18 = arith.constant dense<0.000000e+00> : vector<16x256xf32>
    %33 = tpu.matmul %32, %30, %cst_18 {dimension_numbers = #tpu.dot_dimension_numbers<[1], [0], [0], [1], [0, 0, 1, 1], [], []>} : vector<16x4xf32>, vector<4x256xf32>, vector<16x256xf32> -> vector<16x256xf32>
    %34 = arith.addf %29, %33 : vector<16x256xf32>
    %35 = vector.extract_strided_slice %3 {offsets = [0, 36], sizes = [4, 256], strides = [1, 1]} : vector<4x384xf32> to vector<4x256xf32>
    %c6 = arith.constant 6 : index
    %c0_19 = arith.constant 0 : index
    %c0_20 = arith.constant 0 : index
    %36 = vector.load %arg3[%c6, %c0_19, %c0_20] : memref<9x16x4xf32, #tpu.memory_space<vmem>>, vector<1x16x4xf32>
    %37 = vector.shape_cast %36 : vector<1x16x4xf32> to vector<16x4xf32>
    %cst_21 = arith.constant dense<0.000000e+00> : vector<16x256xf32>
    %38 = tpu.matmul %37, %35, %cst_21 {dimension_numbers = #tpu.dot_dimension_numbers<[1], [0], [0], [1], [0, 0, 1, 1], [], []>} : vector<16x4xf32>, vector<4x256xf32>, vector<16x256xf32> -> vector<16x256xf32>
    %39 = arith.addf %34, %38 : vector<16x256xf32>
    %40 = vector.extract_strided_slice %3 {offsets = [0, 37], sizes = [4, 256], strides = [1, 1]} : vector<4x384xf32> to vector<4x256xf32>
    %c7 = arith.constant 7 : index
    %c0_22 = arith.constant 0 : index
    %c0_23 = arith.constant 0 : index
    %41 = vector.load %arg3[%c7, %c0_22, %c0_23] : memref<9x16x4xf32, #tpu.memory_space<vmem>>, vector<1x16x4xf32>
    %42 = vector.shape_cast %41 : vector<1x16x4xf32> to vector<16x4xf32>
    %cst_24 = arith.constant dense<0.000000e+00> : vector<16x256xf32>
    %43 = tpu.matmul %42, %40, %cst_24 {dimension_numbers = #tpu.dot_dimension_numbers<[1], [0], [0], [1], [0, 0, 1, 1], [], []>} : vector<16x4xf32>, vector<4x256xf32>, vector<16x256xf32> -> vector<16x256xf32>
    %44 = arith.addf %39, %43 : vector<16x256xf32>
    %45 = vector.extract_strided_slice %3 {offsets = [0, 38], sizes = [4, 256], strides = [1, 1]} : vector<4x384xf32> to vector<4x256xf32>
    %c8 = arith.constant 8 : index
    %c0_25 = arith.constant 0 : index
    %c0_26 = arith.constant 0 : index
    %46 = vector.load %arg3[%c8, %c0_25, %c0_26] : memref<9x16x4xf32, #tpu.memory_space<vmem>>, vector<1x16x4xf32>
    %47 = vector.shape_cast %46 : vector<1x16x4xf32> to vector<16x4xf32>
    %cst_27 = arith.constant dense<0.000000e+00> : vector<16x256xf32>
    %48 = tpu.matmul %47, %45, %cst_27 {dimension_numbers = #tpu.dot_dimension_numbers<[1], [0], [0], [1], [0, 0, 1, 1], [], []>} : vector<16x4xf32>, vector<4x256xf32>, vector<16x256xf32> -> vector<16x256xf32>
    %49 = arith.addf %44, %48 : vector<16x256xf32>
    %c0_28 = arith.constant 0 : index
    %c0_29 = arith.constant 0 : index
    %50 = vector.load %arg4[%c0_28, %c0_29] : memref<16x1xf32, #tpu.memory_space<vmem>>, vector<16x1xf32>
    %51 = vector.broadcast %50 : vector<16x1xf32> to vector<16x256xf32>
    %52 = arith.addf %49, %51 : vector<16x256xf32>
    %c0_30 = arith.constant 0 : index
    %53 = memref.load %arg1[%c0_30] : memref<1xf32, #tpu.memory_space<smem>>
    %cst_31 = arith.constant 0.000000e+00 : f32
    %54 = vector.broadcast %cst_31 : f32 to vector<16x256xf32>
    %55 = arith.cmpf oge, %52, %54 : vector<16x256xf32>
    %56 = vector.broadcast %53 : f32 to vector<16x256xf32>
    %57 = arith.mulf %56, %52 : vector<16x256xf32>
    %58 = arith.select %55, %52, %57 : vector<16x256xi1>, vector<16x256xf32>
    %c0_32 = arith.constant 0 : index
    %c0_33 = arith.constant 0 : index
    %59 = vector.load %arg5[%c0_32, %c0_33] : memref<16x256xf32, #tpu.memory_space<vmem>>, vector<16x256xf32>
    tpu.vector_store %arg5[%c0_32, %c0_33], %58 {strides = array<i32>} : memref<16x256xf32, #tpu.memory_space<vmem>>, vector<16x256xf32>,
    return
  }
  func.func @transform_0(%arg0: i32) -> i32 {
    %c0_i32 = arith.constant 0 : i32
    %c0_i32_0 = arith.constant 0 : i32
    return %c0_i32 : i32
  }
  func.func @transform_1(%arg0: i32) -> (i32, i32) {
    %c0_i32 = arith.constant 0 : i32
    %c0_i32_0 = arith.constant 0 : i32
    %c0_i32_1 = arith.constant 0 : i32
    return %c0_i32, %c0_i32_0 : i32, i32
  }
  func.func @transform_2(%arg0: i32) -> (i32, i32, i32) {
    %c0_i32 = arith.constant 0 : i32
    %c0_i32_0 = arith.constant 0 : i32
    %c0_i32_1 = arith.constant 0 : i32
    %c0_i32_2 = arith.constant 0 : i32
    return %c0_i32, %c0_i32_0, %c0_i32_1 : i32, i32, i32
  }
  func.func @transform_3(%arg0: i32) -> (i32, i32) {
    %c0_i32 = arith.constant 0 : i32
    %c0_i32_0 = arith.constant 0 : i32
    %c0_i32_1 = arith.constant 0 : i32
    return %c0_i32, %c0_i32_0 : i32, i32
  }
  func.func @transform_4(%arg0: i32) -> (i32, i32) {
    %c0_i32 = arith.constant 0 : i32
    %c0_i32_0 = arith.constant 0 : i32
    return %c0_i32, %arg0 : i32, i32
  }
}

</mosaic_0001>

<bundles_post_ra>
// kernel: upsample_block.1
= control target key start
LH: loop header
LB: loop body
LE: loop exit
PB: predicated region body
PF: predicated region fallthrough
CT: control target
= control target key end

     0   :  { %s1608_s0 = inlined_call_operand.<no memory space> [shape: f32[1], index: 0, kind: input, shape index: {}]   ;;  %s1609_s1 = inlined_call_operand.vmem [shape: f32[4,896], index: 1, kind: input, shape index: {}]   ;;  %s1610_s2 = inlined_call_operand.vmem [shape: f32[9,16,4], index: 2, kind: input, shape index: {}]   ;;  %s1611_s3 = inlined_call_operand.vmem [shape: f32[16,1], index: 3, kind: input, shape index: {}]   ;;  %s1612_s4 = inlined_call_operand.vmem [shape: f32[16,768], index: 4, kind: output, shape index: {}]  }
   0x1   :  { %9 = sst [smem:[#allocation2]] %s1608_s0 }
   0x2   :  { %s1400_s17 = smov 0   ;;  %s1402_s18 = smov 0  }
   0x3   :  { %s1404_s19 = smov 0  }
   0x4 LB: > { %s1413_s0 = sadd.s32 4294967295, %s1360_s19   ;;  %s1415_s20 = sadd.s32 1, %s1360_s19   ;;  %s1360_s19 = sphi %s1404_s19, %s1616_s19   ;;  %s1356_s18 = sphi %s1402_s18, %s1615_s18   ;;  %s1352_s17 = sphi %s1400_s17, %s1614_s17  }
   0x5   : > { %s103_s21 = ssub.s32 %s1360_s19, %s1415_s20  ;;  %s106_s22 = sadd.s32 1, %s1356_s18 }
   0x6   : > { %p104_p0 = scmp.eq.s32.totalorder %s103_s21, 0  ;;  %p116_p1 = scmp.ne.s32.totalorder %s1356_s18, %s1352_s17 }
   0x7   : > { %p117_p2 = scmp.eq.s32.totalorder %s1413_s0, 2  ;;  %p1205_p3 = scmp.ge.s32.totalorder %s1360_s19, 1 }
   0x8   : > { %s1423_s23 = scalar_select %p104_p0, %s1356_s18, %s106_s22  }
   0x9   : > { %p1425_p4 = por %p117_p2, %p116_p1  ;;  %p153_p5 = scmp.lt.s32.totalorder %s1360_s19, 4 }
   0xb   : > { %p154_p6 = pnand %p1205_p3, %p153_p5 }
   0xc   : > { %s1207_s25 = sshll.u32 (!%p154_p6), %s1413_s0, 8  ;;  %s1362_s5 = smov (!%p154_p6), 109   ;;  %v1364_v3 = vmov (!%p154_p6), 0.0   ;;  %v1371_v4 = vmov (!%p154_p6), 0   ;;  %v1095_v5 = vld [vmem:[%s1611_s3] sm:$0xff] (!%p154_p6)  ;;  %v1096_v6 = vld [vmem:[%s1611_s3 + $0x8] sm:$0xff] (!%p154_p6) }
   0xd   : > { %157 = sbr.rel (%p154_p6) target bundleno = 415 (0x19f), region = 36  ;;  %s175_s26 = sshra.s32 (!%p154_p6), %s1207_s25, 7  ;;  %274 = vmatprep.mubr.f32.mxu1 (!%p154_p6), %v1364_v3  ;;  %666 = vmatprep.mubr.f32.mxu0 (!%p154_p6), %v1364_v3  ;;  %vm195_vm0 = vcmask (!%p154_p6), 1039360   ;;  %vm589_vm1 = vcmask (!%p154_p6), 891904   ;;  %vm205_vm2 = vcmask (!%p154_p6), 1043456   ;;  %v1209_v15 = vld [vmem:[%s1610_s2 + $0x10] sm:$0xff] (!%p154_p6) }
   0xe   : > { %s1208_s27 = sshll.u32 (!%p154_p6), %s175_s26, 2  ;;  %s1363_s6 = smov (!%p154_p6), 127   ;;  %1335 = vset.pattern.permute.xlu0 (!%p154_p6), %v1371_v4  ;;  %1336 = vset.pattern.permute.xlu1 (!%p154_p6), %v1371_v4  ;;  %vm198_vm3 = vcmask (!%p154_p6), 31744   ;;  %v1231_v16 = vld [vmem:[%s1610_s2 + $0x40] sm:$0xff] (!%p154_p6)  ;;  %vm692_vm4 = vcmask (!%p154_p6), 883712   ;;  %v1210_v21 = vld [vmem:[%s1610_s2 + $0x18] sm:$0xff] (!%p154_p6) }
   0xf   : > { %s178_s30 = scalar_lea.vmem (!%p154_p6), %s1609_s1, %s1208_s27  ;;  %s1365_s7 = smov (!%p154_p6), 108   ;;  %v181_v25 = vld [vmem:[%s1610_s2] sm:$0xff] (!%p154_p6)  ;;  %v1237_v26 = vld [vmem:[%s1610_s2 + $0x50] sm:$0xff] (!%p154_p6)  ;;  %vm383_vm5 = vcmask (!%p154_p6), 1031168   ;;  %v182_v30 = vld [vmem:[%s1610_s2 + $0x8] sm:$0xff] (!%p154_p6)  ;;  %vm795_vm6 = vcmask (!%p154_p6), 752640  }
  0x10   : > { %v180_v0 = vld [vmem:[%s178_s30 + $0x8] sm:$0xf] (!%p154_p6)  ;;  %v1433_v1 = vld [vmem:[%s178_s30] sm:$0xff] (!%p154_p6)  ;;  %s1366_s8 = smov (!%p154_p6), 126   ;;  %s1367_s9 = smov (!%p154_p6), 92   ;;  %v1238_v31 = vld [vmem:[%s1610_s2 + $0x58] sm:$0xff] (!%p154_p6) }
  0x11   : > { %587 = vrot.lane.b32.xlu1 (!%p154_p6), %v180_v0, %s1362_s5  ;;  %193 = vrot.lane.b32.xlu0 (!%p154_p6), %v180_v0, %s1363_s6  ;;  %v1437_v2 = vcombine.high (!%p154_p6), %v1433_v1, %v1433_v1  ;;  %s1368_s10 = smov (!%p154_p6), 110   ;;  %s1369_s11 = smov (!%p154_p6), 91   ;;  %v1219_v35 = vld [vmem:[%s1610_s2 + $0x20] sm:$0xff] (!%p154_p6)  ;;  %v1220_v40 = vld [vmem:[%s1610_s2 + $0x28] sm:$0xff] (!%p154_p6)  ;;  %vm486_vm7 = vcmask (!%p154_p6), 900096   ;;  %vm898_vm8 = vcmask (!%p154_p6), 744448  }
  0x12   : > { %s1370_s12 = smov (!%p154_p6), 90   ;;  %v1243_v41 = vld [vmem:[%s1610_s2 + $0x60] sm:$0xff] (!%p154_p6)  ;;  %v1244_v45 = vld [vmem:[%s1610_s2 + $0x68] sm:$0xff] (!%p154_p6)  ;;  %v1225_v49 = vld [vmem:[%s1610_s2 + $0x30] sm:$0xff] (!%p154_p6)  ;;  %vm1001_vm9 = vcmask (!%p154_p6), 736256  }
  0x13   : > { %v1226_v54 = vld [vmem:[%s1610_s2 + $0x38] sm:$0xff] (!%p154_p6)  ;;  %v1249_v55 = vld [vmem:[%s1610_s2 + $0x70] sm:$0xff] (!%p154_p6)  ;;  %v1232_v62 = vld [vmem:[%s1610_s2 + $0x48] sm:$0xff] (!%p154_p6) }
  0x14   : > { %v1250_v59 = vld [vmem:[%s1610_s2 + $0x78] sm:$0xff]  ;;  %v1255_v63 = vld [vmem:[%s1610_s2 + $0x80] sm:$0xff]  ;;  %s1266_s14 = sshll.u32 (%p1425_p4), %s1413_s0, 4 }
  0x15   : > { %585 = vrot.lane.b32.xlu1 %v1437_v2, %s1362_s5  ;;  %191 = vrot.lane.b32.xlu0 %v1437_v2, %s1363_s6  ;;  %s1138_s19 = scalar_lea.vmem (%p1425_p4), %s1612_s4, %s1266_s14 }
  0x19   : > { %583 = vrot.lane.b32.xlu1 %v1433_v1, %s1362_s5  ;;  %189 = vrot.lane.b32.xlu0 %v1433_v1, %s1363_s6 }
  0x1d   : > { %690 = vrot.lane.b32.xlu1 %v180_v0, %s1365_s7  ;;  %688 = vrot.lane.b32.xlu0 %v1437_v2, %s1365_s7 }
  0x21   : > { %379 = vrot.lane.b32.xlu1 %v1437_v2, %s1366_s8  ;;  %686 = vrot.lane.b32.xlu0 %v1433_v1, %s1365_s7 }
  0x25   : > { %791 = vrot.lane.b32.xlu1 %v1437_v2, %s1367_s9  ;;  %381 = vrot.lane.b32.xlu0 %v180_v0, %s1366_s8 }
  0x29   : > { %377 = vrot.lane.b32.xlu1 %v1433_v1, %s1366_s8  ;;  %793 = vrot.lane.b32.xlu0 %v180_v0, %s1367_s9 }
  0x2d   : > { %482 = vrot.lane.b32.xlu1 %v1437_v2, %s1368_s10  ;;  %789 = vrot.lane.b32.xlu0 %v1433_v1, %s1367_s9 }
  0x31   : > { %894 = vrot.lane.b32.xlu1 %v1437_v2, %s1369_s11  ;;  %484 = vrot.lane.b32.xlu0 %v180_v0, %s1368_s10 }
  0x35   : > { %480 = vrot.lane.b32.xlu1 %v1433_v1, %s1368_s10  ;;  %896 = vrot.lane.b32.xlu0 %v180_v0, %s1369_s11 }
  0x39   : > { %997 = vrot.lane.b32.xlu1 %v1437_v2, %s1370_s12  ;;  %892 = vrot.lane.b32.xlu0 %v1433_v1, %s1369_s11  ;;  %s1111_s11 = sld [smem:[#allocation2]] }
  0x3d   : > { %995 = vrot.lane.b32.xlu1 %v1433_v1, %s1370_s12  ;;  %999 = vrot.lane.b32.xlu0 %v180_v0, %s1370_s12  ;;  %v1256_v0 = vld [vmem:[%s1610_s2 + $0x88] sm:$0xff]  ;;  %s170_s12 = sand.u32 1, %s1352_s17  }
  0x3e   : > { %s1206_s13 = sshll.u32 %s170_s12, 5 }
  0x3f   : > { %s172_s17 = scalar_lea.vmem [#allocation3], %s1206_s13 }
  0x41   : > { %1099 = vperm.xlu0 %1335, %v1095_v5   ;;  %1104 = vperm.xlu1 %1336, %v1096_v6  }
  0x83   : > { %v588_v7 = vpop.permute.xlu1 %587  ;;  %v194_v8 = vpop.permute.xlu0 %193 }
  0x87   : > { %v586_v9 = vpop.permute.xlu1 %585  ;;  %v192_v10 = vpop.permute.xlu0 %191 }
  0x88   : > { %v197_v11 = vsel %vm195_vm0, %v192_v10, %v194_v8  ;;  %v1463_v12 = vsel %vm589_vm1, %v586_v9, %v588_v7 }
  0x89   : > { %1211 = vmatprep.subr.msk.mxu1 %vm205_vm2, %v197_v11  ;;  %1233 = vmatprep.subr.msk.mxu0 %vm205_vm2, %v1463_v12  ;;  %v1116_v11 = vstv %s1111_s11 }
  0x8b   : > { %v584_v13 = vpop.permute.xlu1 %583  ;;  %v190_v14 = vpop.permute.xlu0 %189 }
  0x8c   : > { %v196_v17 = vsel %vm195_vm0, %v190_v14, %v192_v10  ;;  %v1474_v18 = vsel %vm589_vm1, %v584_v13, %v586_v9 }
  0x8d   : > { %1212 = vmatpush1.msk.msra.mxu1 %vm205_vm2, %v196_v17  ;;  %1234 = vmatpush1.msk.msra.mxu0 %vm205_vm2, %v1474_v18 }
  0x8e   : > { %1213 = vmatmul.mubr.msk.f32.vlgmr.msra.gmra.mrb[0].mxu1 %vm198_vm3, %v1209_v15  ;;  %1235 = vmatmul.mubr.msk.f32.vlgmr.msra.gmra.mrb[0].mxu0 %vm198_vm3, %v1231_v16 }
  0x8f   : > { %v691_v19 = vpop.permute.xlu1 %690  ;;  %v689_v20 = vpop.permute.xlu0 %688  ;;  %280 = vmatprep.mubr.f32.mxu1 %v1364_v3  ;;  %1215 = vmatprep.subr.msk.mxu1 %vm205_vm2, %v1437_v2 }
  0x90   : > { %v694_v22 = vsel %vm692_vm4, %v689_v20, %v691_v19  ;;  %1216 = vmatpush1.msk.msra.mxu1 %vm205_vm2, %v1433_v1  ;;  %769 = vmatprep.mubr.f32.mxu0 %v1364_v3 }
  0x91   : > { %1239 = vmatprep.subr.msk.mxu0 %vm205_vm2, %v694_v22 }
  0x92   : > { %1214 = vmatmul.mubr.msk.f32.gmra.mrb[2].mxu1 %vm198_vm3, %v1210_v21 }
  0x93   : > { %v380_v23 = vpop.permute.xlu1 %379  ;;  %v687_v24 = vpop.permute.xlu0 %686  ;;  %361 = vmatprep.mubr.f32.mxu1 %v1364_v3 }
  0x94   : > { %v693_v27 = vsel %vm692_vm4, %v687_v24, %v689_v20 }
  0x95   : > { %1240 = vmatpush1.msk.msra.mxu0 %vm205_vm2, %v693_v27 }
  0x96   : > { %1217 = vmatmul.mubr.msk.f32.vlgmr.msra.gmra.mrb[0].mxu1 %vm198_vm3, %v181_v25  ;;  %1241 = vmatmul.mubr.msk.f32.vlgmr.msra.gmra.mrb[0].mxu0 %vm198_vm3, %v1237_v26 }
  0x97   : > { %v792_v28 = vpop.permute.xlu1 %791  ;;  %v382_v29 = vpop.permute.xlu0 %381  ;;  %367 = vmatprep.mubr.f32.mxu1 %v1364_v3  ;;  %775 = vmatprep.mubr.f32.mxu0 %v1364_v3 }
  0x98   : > { %v385_v32 = vsel %vm383_vm5, %v380_v23, %v382_v29 }
  0x99   : > { %1221 = vmatprep.subr.msk.mxu1 %vm205_vm2, %v385_v32 }
  0x9a   : > { %1218 = vmatmul.mubr.msk.f32.gmra.mrb[2].mxu1 %vm198_vm3, %v182_v30  ;;  %1242 = vmatmul.mubr.msk.f32.gmra.mrb[2].mxu0 %vm198_vm3, %v1238_v31 }
  0x9b   : > { %v378_v33 = vpop.permute.xlu1 %377  ;;  %v794_v34 = vpop.permute.xlu0 %793  ;;  %460 = vmatprep.mubr.f32.mxu1 %v1364_v3  ;;  %872 = vmatprep.mubr.f32.mxu0 %v1364_v3 }
  0x9c   : > { %v384_v36 = vsel %vm383_vm5, %v378_v33, %v380_v23  ;;  %v797_v37 = vsel %vm795_vm6, %v792_v28, %v794_v34 }
  0x9d   : > { %1222 = vmatpush1.msk.msra.mxu1 %vm205_vm2, %v384_v36  ;;  %1245 = vmatprep.subr.msk.mxu0 %vm205_vm2, %v797_v37 }
  0x9e   : > { %1223 = vmatmul.mubr.msk.f32.vlgmr.msra.gmra.mrb[0].mxu1 %vm198_vm3, %v1219_v35 }
  0x9f   : > { %v483_v38 = vpop.permute.xlu1 %482  ;;  %v790_v39 = vpop.permute.xlu0 %789  ;;  %466 = vmatprep.mubr.f32.mxu1 %v1364_v3 }
  0xa0   : > { %v796_v42 = vsel %vm795_vm6, %v790_v39, %v792_v28 }
  0xa1   : > { %1246 = vmatpush1.msk.msra.mxu0 %vm205_vm2, %v796_v42 }
  0xa2   : > { %1224 = vmatmul.mubr.msk.f32.gmra.mrb[2].mxu1 %vm198_vm3, %v1220_v40  ;;  %1247 = vmatmul.mubr.msk.f32.vlgmr.msra.gmra.mrb[0].mxu0 %vm198_vm3, %v1243_v41 }
  0xa3   : > { %v895_v43 = vpop.permute.xlu1 %894  ;;  %v485_v44 = vpop.permute.xlu0 %484  ;;  %563 = vmatprep.mubr.f32.mxu1 %v1364_v3  ;;  %878 = vmatprep.mubr.f32.mxu0 %v1364_v3 }
  0xa4   : > { %v488_v46 = vsel %vm486_vm7, %v483_v38, %v485_v44 }
  0xa5   : > { %1227 = vmatprep.subr.msk.mxu1 %vm205_vm2, %v488_v46 }
  0xa6   : > { %1248 = vmatmul.mubr.msk.f32.gmra.mrb[2].mxu0 %vm198_vm3, %v1244_v45 }
  0xa7   : > { %v481_v47 = vpop.permute.xlu1 %480  ;;  %v897_v48 = vpop.permute.xlu0 %896  ;;  %975 = vmatprep.mubr.f32.mxu0 %v1364_v3 }
  0xa8   : > { %v487_v50 = vsel %vm486_vm7, %v481_v47, %v483_v38  ;;  %v900_v51 = vsel %vm898_vm8, %v895_v43, %v897_v48 }
  0xa9   : > { %1228 = vmatpush1.msk.msra.mxu1 %vm205_vm2, %v487_v50  ;;  %1251 = vmatprep.subr.msk.mxu0 %vm205_vm2, %v900_v51 }
  0xaa   : > { %1229 = vmatmul.mubr.msk.f32.vlgmr.msra.gmra.mrb[0].mxu1 %vm198_vm3, %v1225_v49  ;;  %1267 = vmatprep.subr.msk.mxu1 %vm205_vm2, %v1463_v12 }
  0xab   : > { %v998_v52 = vpop.permute.xlu1 %997  ;;  %1268 = vmatpush1.msk.msra.mxu1 %vm205_vm2, %v1474_v18  ;;  %v893_v53 = vpop.permute.xlu0 %892  ;;  %569 = vmatprep.mubr.f32.mxu1 %v1364_v3 }
  0xac   : > { %v899_v56 = vsel %vm898_vm8, %v893_v53, %v895_v43 }
  0xad   : > { %1252 = vmatpush1.msk.msra.mxu0 %vm205_vm2, %v899_v56 }
  0xae   : > { %1230 = vmatmul.mubr.msk.f32.gmra.mrb[2].mxu1 %vm198_vm3, %v1226_v54  ;;  %1253 = vmatmul.mubr.msk.f32.vlgmr.msra.gmra.mrb[0].mxu0 %vm198_vm3, %v1249_v55 }
  0xaf   : > { %v996_v57 = vpop.permute.xlu1 %995  ;;  %v1000_v58 = vpop.permute.xlu0 %999  ;;  %981 = vmatprep.mubr.f32.mxu0 %v1364_v3  ;;  %672 = vmatprep.mubr.f32.mxu1 %v1364_v3 }
  0xb0   : > { %v1002_v60 = vsel %vm1001_vm9, %v996_v57, %v998_v52  ;;  %v1003_v61 = vsel %vm1001_vm9, %v998_v52, %v1000_v58 }
  0xb1   : > { %1257 = vmatprep.subr.msk.mxu0 %vm205_vm2, %v1003_v61 }
  0xb2   : > { %1254 = vmatmul.mubr.msk.f32.gmra.mrb[2].mxu0 %vm198_vm3, %v1250_v59 }
  0xb3   : > { %1258 = vmatpush1.msk.msra.mxu0 %vm205_vm2, %v1002_v60  ;;  %1078 = vmatprep.mubr.f32.mxu0 %v1364_v3 }
  0xb6   : > { %1236 = vmatmul.mubr.msk.f32.vlgmr.msra.gmra.mrb[2].mxu1 %vm198_vm3, %v1232_v62  ;;  %1259 = vmatmul.mubr.msk.f32.vlgmr.msra.gmra.mrb[0].mxu0 %vm198_vm3, %v1255_v63 }
  0xb7   : > { %1084 = vmatprep.mubr.f32.mxu0 %v1364_v3 }
  0xba   : > { %1260 = vmatmul.mubr.msk.f32.gmra.mrb[2].mxu0 %vm198_vm3, %v1256_v0 }
  0xc0   : > { %v1100_v4 = vpop.permute.xlu0 %1099  ;;  %v1105_v14 = vpop.permute.xlu1 %1104 }
 0x17d   : > { %v565_v1 = vpop.f32.mrb[0].mxu1 }
 0x17e   : > { %v567_v2 = vpop.f32.mrb[1].mxu1 }
 0x189   : > { %v674_v5 = vpop.f32.mrb[2].mxu1  ;;  %v1080_v6 = vpop.f32.mrb[0].mxu0 }
 0x18a   : > { %v1269_v7 = vadd.f32 %v1080_v6, %v565_v1  ;;  %v676_v8 = vpop.f32.mrb[3].mxu1  ;;  %v1082_v9 = vpop.f32.mrb[1].mxu0 }
 0x18b   : > { %v1270_v10 = vadd.f32 %v1082_v9, %v567_v2 }
 0x18c   : > { %v1107_v3 = vadd.f32 %v1269_v7, %v1100_v4 }
 0x18d   : > { %v1108_v12 = vadd.f32 %v1270_v10, %v1100_v4  ;;  %v1086_v13 = vpop.f32.mrb[2].mxu0 }
 0x18e   : > { %vm1112_vm10 = vcmp.ge.f32.partialorder %v1107_v3, 0.0  ;;  %v1117_v15 = vmul.f32 %v1116_v11, %v1107_v3  ;;  %v1271_v16 = vadd.f32 %v1086_v13, %v674_v5  ;;  %v1088_v17 = vpop.f32.mrb[3].mxu0 }
 0x18f   : > { %vm1113_vm11 = vcmp.ge.f32.partialorder %v1108_v12, 0.0  ;;  %v1118_v18 = vmul.f32 %v1116_v11, %v1108_v12  ;;  %v1272_v19 = vadd.f32 %v1088_v17, %v676_v8 }
 0x190   : > { %v1121_v20 = vsel %vm1112_vm10, %v1107_v3, %v1117_v15  ;;  %v1109_v21 = vadd.f32 %v1271_v16, %v1105_v14  ;;  %1135 = sbr.rel (!%p1425_p4) target bundleno = 415 (0x19f), region = 40 }
 0x191   : > { %v1122_v22 = vsel %vm1113_vm11, %v1108_v12, %v1118_v18  ;;  %1125 = vst [vmem:[%s172_s17] sm:$0xff] %v1121_v20  ;;  %v1110_v23 = vadd.f32 %v1272_v19, %v1105_v14 }
 0x192   : > { %1126 = vst [vmem:[%s172_s17 + $0x8] sm:$0xff] %v1122_v22  ;;  %vm1114_vm12 = vcmp.ge.f32.partialorder %v1109_v21, 0.0  ;;  %v1119_v24 = vmul.f32 %v1116_v11, %v1109_v21 }
 0x193   : > { %vm1115_vm13 = vcmp.ge.f32.partialorder %v1110_v23, 0.0  ;;  %v1120_v25 = vmul.f32 %v1116_v11, %v1110_v23 }
 0x194   : > { %v1123_v26 = vsel %vm1114_vm12, %v1109_v21, %v1119_v24 }
 0x195   : > { %v1124_v27 = vsel %vm1115_vm13, %v1110_v23, %v1120_v25  ;;  %1127 = vst [vmem:[%s172_s17 + $0x10] sm:$0xff] %v1123_v26 }
 0x196   : > { %1128 = vst [vmem:[%s172_s17 + $0x18] sm:$0xff] %v1124_v27 }
 0x198   : > { %v1151_v28 = vld [vmem:[%s172_s17] sm:$0xff] }
 0x199   : > { %v1153_v29 = vld [vmem:[%s172_s17 + $0x8] sm:$0xff]  ;;  %1152 = vst [vmem:[%s1138_s19] sm:$0xff] %v1151_v28 }
 0x19a   : > { %1154 = vst [vmem:[%s1138_s19 + $0x8] sm:$0xff] %v1153_v29 }
 0x19c   : > { %v1155_v30 = vld [vmem:[%s172_s17 + $0x10] sm:$0xff] }
 0x19d   : > { %v1157_v31 = vld [vmem:[%s172_s17 + $0x18] sm:$0xff]  ;;  %1156 = vst [vmem:[%s1138_s19 + $0x30] sm:$0xff] %v1155_v30 }
 0x19e   : > { %1158 = vst [vmem:[%s1138_s19 + $0x38] sm:$0xff] %v1157_v31 }
 0x19f PF: > { %p12_p7 = scmp.ge.s32.totalorder %s1415_s20, 5   ;;  %s1614_s17 = smov %s1356_s18 }
 0x1a0   : > { %s1615_s18 = smov %s1423_s23  ;;  %s1616_s19 = smov %s1415_s20 }
 0x1a1   :  { %14 = sbr.rel (!%p12_p7) target bundleno = 4 (0x4), region = 95 }

</bundles_post_ra>
